<compile_context>
chip_gen: v6e
topology: v6e:2x2x1
jax: 0.10.0
libtpu: 0.0.40
codegen_flags: <defaults>
</compile_context>

<pallas_src>
import math
import functools

import jax
import jax.numpy as jnp
from jax.experimental import pallas as pl
from jax.experimental.pallas import tpu as pltpu


_LANE = 128
_SUBLANE = 8
_TK_CAP = 2304                      # bf16 patch block <= 2.25 MiB at tn=512
_VMEM_LIMIT = 64 * 1024 * 1024      # safe on v5e/v6e (128 MiB) and v7x (64 MiB)


def _round_up(x, m):
    return (x + m - 1) // m * m


def _col_tile(mp):
    """Lane (minor) tile for the padded spatial axis (mp % 128 == 0)."""
    for t in (512, 256, 128):
        if mp % t == 0 and mp // t >= 2:
            return t
    return mp            # mp == 128


def _k_tile(kp):
    """Contraction tile (kp % 8 == 0)."""
    if kp <= _TK_CAP:
        return kp
    for t in range(_TK_CAP, _SUBLANE - 1, -_SUBLANE):
        if kp % t == 0:
            return t
    return kp            # TODO(synk): pad K instead for awkward channel counts


def _compiler_params():
    return pltpu.CompilerParams(
        dimension_semantics=("parallel", "arbitrary"),
        vmem_limit_bytes=_VMEM_LIMIT)


# ---------------------------------------------------------------------------
# Pallas kernels (channel-major GEMMs, K-tiled, fused epilogues)
# ---------------------------------------------------------------------------
def _conv1_kernel(pat_ref, w_ref, shift_ref, c1_ref, acc_ref):
    """c1 = relu((scale2*W1)^T @ patches + shift2)  -> bf16, lane-dense."""
    k = pl.program_id(1)

    @pl.when(k == 0)
    def _():
        acc_ref[...] = jnp.zeros_like(acc_ref)

    acc_ref[...] += jnp.dot(w_ref[...], pat_ref[...],
                            preferred_element_type=jnp.float32)

    @pl.when(k == pl.num_programs(1) - 1)
    def _():
        c1_ref[...] = jnp.maximum(acc_ref[...] + shift_ref[...],
                                  0.0).astype(c1_ref.dtype)


def _conv1_shortcut_kernel(pat_ref, w_ref, shift_ref, ctr_ref, wsc_ref,
                           c1_ref, res_ref, acc_ref):
    """_conv1_kernel plus the fused 1x1/stride-s shortcut conv.

    The shortcut input is exactly the centre tap of the 3x3 window, passed as
    its own (Cin, tn) operand so it does not block K-tiling; it is computed
    once per M tile (k == 0)."""
    k = pl.program_id(1)

    @pl.when(k == 0)
    def _():
        acc_ref[...] = jnp.zeros_like(acc_ref)
        res_ref[...] = jnp.dot(wsc_ref[...], ctr_ref[...],
                               preferred_element_type=jnp.float32)

    acc_ref[...] += jnp.dot(w_ref[...], pat_ref[...],
                            preferred_element_type=jnp.float32)

    @pl.when(k == pl.num_programs(1) - 1)
    def _():
        c1_ref[...] = jnp.maximum(acc_ref[...] + shift_ref[...],
                                  0.0).astype(c1_ref.dtype)


def _conv2_kernel(pat_ref, w_ref, res_ref, o_ref, acc_ref):
    """out = W2^T @ patches + residual   (residual add fused, f32)."""
    k = pl.program_id(1)

    @pl.when(k == 0)
    def _():
        acc_ref[...] = jnp.zeros_like(acc_ref)

    acc_ref[...] += jnp.dot(w_ref[...], pat_ref[...],
                            preferred_element_type=jnp.float32)

    @pl.when(k == pl.num_programs(1) - 1)
    def _():
        o_ref[...] = acc_ref[...] + res_ref[...]


# ---------------------------------------------------------------------------
# pallas_call wrappers
# ---------------------------------------------------------------------------
def conv1_fused(pat, w1s, shift2, ctr=None, wsc=None):
    """c1 = relu(w1s @ pat + shift2) (bf16); optionally res = wsc @ ctr (f32)."""
    kp, mp = pat.shape
    cout = w1s.shape[0]
    tn = _col_tile(mp)
    tk = _k_tile(kp)
    grid = (mp // tn, kp // tk)

    pat_spec = pl.BlockSpec((tk, tn), lambda i, k: (k, i))
    w_spec = pl.BlockSpec((cout, tk), lambda i, k: (0, k))
    shift_spec = pl.BlockSpec((cout, 1), lambda i, k: (0, 0))
    col_spec = pl.BlockSpec((cout, tn), lambda i, k: (0, i))
    scratch = [pltpu.VMEM((cout, tn), jnp.float32)]

    if ctr is None:
        return pl.pallas_call(
            _conv1_kernel,
            out_shape=jax.ShapeDtypeStruct((cout, mp), jnp.bfloat16),
            grid=grid,
            in_specs=[pat_spec, w_spec, shift_spec],
            out_specs=col_spec,
            scratch_shapes=scratch,
            compiler_params=_compiler_params(),
        )(pat, w1s, shift2)

    cinp = ctr.shape[0]
    return pl.pallas_call(
        _conv1_shortcut_kernel,
        out_shape=(jax.ShapeDtypeStruct((cout, mp), jnp.bfloat16),
                   jax.ShapeDtypeStruct((cout, mp), jnp.float32)),
        grid=grid,
        in_specs=[pat_spec, w_spec, shift_spec,
                  pl.BlockSpec((cinp, tn), lambda i, k: (0, i)),
                  pl.BlockSpec((cout, cinp), lambda i, k: (0, 0))],
        out_specs=(col_spec, pl.BlockSpec((cout, tn), lambda i, k: (0, i))),
        scratch_shapes=scratch,
        compiler_params=_compiler_params(),
    )(pat, w1s, shift2, ctr, wsc)


def conv2_fused(pat, w2t, res):
    """out = w2t @ pat + res   (f32 output, residual add fused)."""
    kp, mp = pat.shape
    cout = w2t.shape[0]
    tn = _col_tile(mp)
    tk = _k_tile(kp)
    grid = (mp // tn, kp // tk)
    return pl.pallas_call(
        _conv2_kernel,
        out_shape=jax.ShapeDtypeStruct((cout, mp), jnp.float32),
        grid=grid,
        in_specs=[pl.BlockSpec((tk, tn), lambda i, k: (k, i)),
                  pl.BlockSpec((cout, tk), lambda i, k: (0, k)),
                  pl.BlockSpec((cout, tn), lambda i, k: (0, i))],
        out_specs=pl.BlockSpec((cout, tn), lambda i, k: (0, i)),
        scratch_shapes=[pltpu.VMEM((cout, tn), jnp.float32)],
        compiler_params=_compiler_params(),
    )(pat, w2t, res)


# ---------------------------------------------------------------------------
# Glue (plain JAX, fused by XLA): BN folding, padding, channel-major im2col
# ---------------------------------------------------------------------------
def _bn_relu_cm(x_cm, gamma, beta, mean, var, eps=1e-5):
    inv = 1.0 / jnp.sqrt(var + eps)
    scale = (gamma * inv).reshape(-1, 1, 1, 1)
    shift = (beta - mean * gamma * inv).reshape(-1, 1, 1, 1)
    return jnp.maximum(x_cm * scale + shift, 0.0)


def _bn_scale_shift(gamma, beta, mean, var, eps=1e-5):
    inv = 1.0 / jnp.sqrt(var + eps)
    scale = gamma * inv
    shift = beta - mean * scale
    return scale.astype(jnp.float32), shift.astype(jnp.float32)


def _pad_axis(x, axis, new_size):
    if x.shape[axis] == new_size:
        return x
    pads = [(0, 0)] * x.ndim
    pads[axis] = (0, new_size - x.shape[axis])
    return jnp.pad(x, pads)


def _im2col_cm(x_cm, stride):
    """Channel-major im2col: (C,N,H,W) -> (9*C, N*Ho*Wo), tap-major rows.

    TODO(synk): replace with in-kernel 9-tap accumulation from a VMEM halo
    tile to avoid the 9x activation HBM traffic at production widths."""
    C, N, H, W = x_cm.shape
    xp = jnp.pad(x_cm, ((0, 0), (0, 0), (1, 1), (1, 1)))
    Ho = (H - 1) // stride + 1
    Wo = (W - 1) // stride + 1
    taps = []
    for ky in range(3):
        for kx in range(3):
            taps.append(xp[:, :,
                           ky:ky + stride * (Ho - 1) + 1:stride,
                           kx:kx + stride * (Wo - 1) + 1:stride])
    pat = jnp.stack(taps, axis=0).reshape(9 * C, N * Ho * Wo)
    return pat, (Ho, Wo)


def basic_block_forward(x_cm, p, stride):
    cin, N, H, W = x_cm.shape
    w1 = p["conv1"]                                  # HWIO (3,3,Cin,Cout)
    cout = w1.shape[-1]
    equal_in_out = (cin == cout)                     # static (from shapes)
    assert not (equal_in_out and stride != 1), \
        "equal-in/out BasicBlock requires stride == 1 (same as PyTorch)"

    # a = relu(bn1(x)) in plain JAX (cannot be a kernel prologue on the
    # patches: zero-padding is applied AFTER bn+relu and relu(bn(0)) != 0).
    a = _bn_relu_cm(x_cm, *p["bn1"])

    pat1, (Ho, Wo) = _im2col_cm(a, stride)
    M = N * Ho * Wo
    Mp = _round_up(M, _LANE)
    K1p = _round_up(9 * cin, _SUBLANE)
    pat1 = _pad_axis(_pad_axis(pat1, 1, Mp), 0, K1p).astype(jnp.bfloat16)

    # Fold the bn2 scale into the conv1 weight columns in f32, then cast.
    scale2, shift2 = _bn_scale_shift(*p["bn2"])
    w1s = (w1 * scale2[None, None, None, :]).transpose(3, 0, 1, 2)
    w1s = _pad_axis(w1s.reshape(cout, 9 * cin), 1, K1p).astype(jnp.bfloat16)
    shift2 = shift2.reshape(cout, 1)

    if equal_in_out:
        c1 = conv1_fused(pat1, w1s, shift2)
        res = _pad_axis(x_cm.reshape(cin, M), 1, Mp)           # identity (f32)
    else:
        # 1x1/stride-s shortcut input == the centre tap of the 3x3 window.
        cinp = _round_up(cin, _SUBLANE)
        ctr = a[:, :, ::stride, ::stride].reshape(cin, M)
        ctr = _pad_axis(_pad_axis(ctr, 1, Mp), 0, cinp).astype(jnp.bfloat16)
        wsc = p["short"].reshape(cin, cout).T                  # (Cout, Cin)
        wsc = _pad_axis(wsc, 1, cinp).astype(jnp.bfloat16)
        c1, res = conv1_fused(pat1, w1s, shift2, ctr, wsc)

    # conv2 (3x3, stride 1) with the residual add fused; c1 stays bf16 and
    # channel-major (no transpose, no f32 round trip).
    pat2, _ = _im2col_cm(c1[:, :M].reshape(cout, N, Ho, Wo), 1)
    K2p = _round_up(9 * cout, _SUBLANE)
    pat2 = _pad_axis(_pad_axis(pat2, 1, Mp), 0, K2p)
    w2t = p["conv2"].transpose(3, 0, 1, 2).reshape(cout, 9 * cout)
    w2t = _pad_axis(w2t, 1, K2p).astype(jnp.bfloat16)

    out = conv2_fused(pat2, w2t, res)                          # (Cout, Mp) f32
    return out[:, :M].reshape(cout, N, Ho, Wo)


def network_block_forward(x_nchw, params, stride):
    # Channel-major end-to-end; layout conversion only at the stack boundary.
    x_cm = jnp.transpose(x_nchw, (1, 0, 2, 3))
    for i, p in enumerate(params):
        x_cm = basic_block_forward(x_cm, p, stride if i == 0 else 1)
    return jnp.transpose(x_cm, (1, 0, 2, 3))


# ---------------------------------------------------------------------------
# Deterministic parameter init (matches PyTorch module shapes; HWIO weights)
# ---------------------------------------------------------------------------
def init_params(key, nb_layers, in_planes, out_planes):
    params = []
    cin = in_planes
    for _ in range(nb_layers):
        key, *ks = jax.random.split(key, 14)
        n = 3 * 3 * out_planes
        std = math.sqrt(2.0 / n)
        p = {
            "conv1": jax.random.normal(ks[0], (3, 3, cin, out_planes),
                                       jnp.float32) * std,
            "conv2": jax.random.normal(ks[1], (3, 3, out_planes, out_planes),
                                       jnp.float32) * std,
            "bn1": (1.0 + 0.1 * jax.random.normal(ks[2], (cin,), jnp.float32),
                    0.1 * jax.random.normal(ks[3], (cin,), jnp.float32),
                    0.1 * jax.random.normal(ks[4], (cin,), jnp.float32),
                    jax.random.uniform(ks[5], (cin,), jnp.float32, 0.5, 1.5)),
            "bn2": (1.0 + 0.1 * jax.random.normal(ks[6], (out_planes,), jnp.float32),
                    0.1 * jax.random.normal(ks[7], (out_planes,), jnp.float32),
                    0.1 * jax.random.normal(ks[8], (out_planes,), jnp.float32),
                    jax.random.uniform(ks[9], (out_planes,), jnp.float32, 0.5, 1.5)),
        }
        if cin != out_planes:
            p["short"] = jax.random.normal(ks[10], (1, 1, cin, out_planes),
                                           jnp.float32) * math.sqrt(2.0 / out_planes)
        params.append(p)
        cin = out_planes
    return params


# ---------------------------------------------------------------------------
# Pure-JAX reference (lax.conv), mirroring the bf16/f32 precision choices
# ---------------------------------------------------------------------------
def _bn_relu_nchw(x, gamma, beta, mean, var, eps=1e-5):
    inv = 1.0 / jnp.sqrt(var + eps)
    scale = (gamma * inv).reshape(1, -1, 1, 1)
    shift = (beta - mean * gamma * inv).reshape(1, -1, 1, 1)
    return jnp.maximum(x * scale + shift, 0.0)


def _conv_ref(x, w, stride, pad):
    return jax.lax.conv_general_dilated(
        x.astype(jnp.bfloat16), w.astype(jnp.bfloat16),
        (stride, stride), [(pad, pad), (pad, pad)],
        dimension_numbers=("NCHW", "HWIO", "NCHW"),
        preferred_element_type=jnp.float32)


def network_block_ref(x, params, stride):
    for i, p in enumerate(params):
        s = stride if i == 0 else 1
        cin, cout = x.shape[1], p["conv1"].shape[-1]
        a = _bn_relu_nchw(x, *p["bn1"])
        out = _conv_ref(a, p["conv1"], s, 1)
        out = _bn_relu_nchw(out, *p["bn2"])
        out = _conv_ref(out, p["conv2"], 1, 1)
        short = x if cin == cout else _conv_ref(a, p["short"], s, 0)
        x = short + out
    return x


# ---------------------------------------------------------------------------
if __name__ == "__main__":
    key = jax.random.PRNGKey(0)
    kx, kp = jax.random.split(key)

    # NetworkBlock(nb_layers=2, in_planes=4, out_planes=8, block=BasicBlock,
    #              stride=2, dropRate=0.0), fixed slimmable width (inference).
    nb_layers, in_planes, out_planes, stride = 2, 4, 8, 2
    x = jax.random.normal(kx, (2, in_planes, 16, 16), jnp.float32)   # NCHW

    params = init_params(kp, nb_layers, in_planes, out_planes)

    fwd = jax.jit(functools.partial(network_block_forward, stride=stride))
    out = jax.block_until_ready(fwd(x, params))

    ref = network_block_ref(x, params, stride)
    assert out.shape == (2, out_planes, 8, 8), out.shape
    err = float(jnp.max(jnp.abs(out - ref)))
    assert jnp.allclose(out, ref, atol=5e-2, rtol=5e-2), err

    print("KERNEL_OK")
</pallas_src>

<mosaic_0001>
module attributes {stable_mosaic.version = 11 : i64} {
  func.func @_conv1_shortcut_kernel(%arg0: i32, %arg1: i32, %arg2: memref<40x128xbf16, #tpu.memory_space<vmem>>, %arg3: memref<8x40xbf16, #tpu.memory_space<vmem>>, %arg4: memref<8x1xf32, #tpu.memory_space<vmem>>, %arg5: memref<8x128xbf16, #tpu.memory_space<vmem>>, %arg6: memref<8x8xbf16, #tpu.memory_space<vmem>>, %arg7: memref<8x128xbf16, #tpu.memory_space<vmem>>, %arg8: memref<8x128xf32, #tpu.memory_space<vmem>>, %arg9: memref<8x128xf32, #tpu.memory_space<vmem>>) attributes {dimension_semantics = [#tpu.dimension_semantics<parallel>, #tpu.dimension_semantics<arbitrary>], iteration_bounds = array<i64: 1, 1>, scalar_prefetch = 0 : i64, scratch_operands = 1 : i64, tpu.core_type = #tpu.core_type<tc>, window_params = [{transform_indices = @transform_0, window_bounds = array<i64: 40, 128>}, {transform_indices = @transform_1, window_bounds = array<i64: 8, 40>}, {pipeline_mode = #tpu.pipeline_mode<synchronous>, transform_indices = @transform_2, window_bounds = array<i64: 8, 1>}, {transform_indices = @transform_3, window_bounds = array<i64: 8, 128>}, {pipeline_mode = #tpu.pipeline_mode<synchronous>, transform_indices = @transform_4, window_bounds = array<i64: 8, 8>}, {transform_indices = @transform_5, window_bounds = array<i64: 8, 128>}, {transform_indices = @transform_6, window_bounds = array<i64: 8, 128>}]} {
    %c0_i32 = arith.constant 0 : i32
    %0 = arith.cmpi eq, %arg1, %c0_i32 : i32
    %1 = arith.extui %0 : i1 to i32
    %c0_i32_0 = arith.constant 0 : i32
    %2 = arith.cmpi ne, %1, %c0_i32_0 : i32
    scf.if %2 {
      %cst_10 = arith.constant 0.000000e+00 : f32
      %12 = vector.broadcast %cst_10 : f32 to vector<8x128xf32>
      %c0_11 = arith.constant 0 : index
      %c0_12 = arith.constant 0 : index
      %13 = vector.load %arg9[%c0_11, %c0_12] : memref<8x128xf32, #tpu.memory_space<vmem>>, vector<8x128xf32>
      tpu.vector_store %arg9[%c0_11, %c0_12], %12 {strides = array<i32>} : memref<8x128xf32, #tpu.memory_space<vmem>>, vector<8x128xf32>,
      %c0_13 = arith.constant 0 : index
      %c0_14 = arith.constant 0 : index
      %14 = vector.load %arg6[%c0_13, %c0_14] : memref<8x8xbf16, #tpu.memory_space<vmem>>, vector<8x8xbf16>
      %c0_15 = arith.constant 0 : index
      %c0_16 = arith.constant 0 : index
      %15 = vector.load %arg5[%c0_15, %c0_16] : memref<8x128xbf16, #tpu.memory_space<vmem>>, vector<8x128xbf16>
      %cst_17 = arith.constant dense<0.000000e+00> : vector<8x128xf32>
      %16 = tpu.matmul %14, %15, %cst_17 {dimension_numbers = #tpu.dot_dimension_numbers<[1], [0], [0], [1], [0, 0, 1, 1], [], []>} : vector<8x8xbf16>, vector<8x128xbf16>, vector<8x128xf32> -> vector<8x128xf32>
      %c0_18 = arith.constant 0 : index
      %c0_19 = arith.constant 0 : index
      %17 = vector.load %arg8[%c0_18, %c0_19] : memref<8x128xf32, #tpu.memory_space<vmem>>, vector<8x128xf32>
      tpu.vector_store %arg8[%c0_18, %c0_19], %16 {strides = array<i32>} : memref<8x128xf32, #tpu.memory_space<vmem>>, vector<8x128xf32>,
    } else {
    }
    %c0 = arith.constant 0 : index
    %c0_1 = arith.constant 0 : index
    %3 = vector.load %arg9[%c0, %c0_1] : memref<8x128xf32, #tpu.memory_space<vmem>>, vector<8x128xf32>
    %c0_2 = arith.constant 0 : index
    %c0_3 = arith.constant 0 : index
    %4 = vector.load %arg3[%c0_2, %c0_3] : memref<8x40xbf16, #tpu.memory_space<vmem>>, vector<8x40xbf16>
    %c0_4 = arith.constant 0 : index
    %c0_5 = arith.constant 0 : index
    %5 = vector.load %arg2[%c0_4, %c0_5] : memref<40x128xbf16, #tpu.memory_space<vmem>>, vector<40x128xbf16>
    %cst = arith.constant dense<0.000000e+00> : vector<8x128xf32>
    %6 = tpu.matmul %4, %5, %cst {dimension_numbers = #tpu.dot_dimension_numbers<[1], [0], [0], [1], [0, 0, 1, 1], [], []>} : vector<8x40xbf16>, vector<40x128xbf16>, vector<8x128xf32> -> vector<8x128xf32>
    %7 = arith.addf %3, %6 : vector<8x128xf32>
    %c0_6 = arith.constant 0 : index
    %c0_7 = arith.constant 0 : index
    %8 = vector.load %arg9[%c0_6, %c0_7] : memref<8x128xf32, #tpu.memory_space<vmem>>, vector<8x128xf32>
    tpu.vector_store %arg9[%c0_6, %c0_7], %7 {strides = array<i32>} : memref<8x128xf32, #tpu.memory_space<vmem>>, vector<8x128xf32>,
    %c0_i32_8 = arith.constant 0 : i32
    %9 = arith.cmpi eq, %arg1, %c0_i32_8 : i32
    %10 = arith.extui %9 : i1 to i32
    %c0_i32_9 = arith.constant 0 : i32
    %11 = arith.cmpi ne, %10, %c0_i32_9 : i32
    scf.if %11 {
      %c0_10 = arith.constant 0 : index
      %c0_11 = arith.constant 0 : index
      %12 = vector.load %arg9[%c0_10, %c0_11] : memref<8x128xf32, #tpu.memory_space<vmem>>, vector<8x128xf32>
      %c0_12 = arith.constant 0 : index
      %c0_13 = arith.constant 0 : index
      %13 = vector.load %arg4[%c0_12, %c0_13] : memref<8x1xf32, #tpu.memory_space<vmem>>, vector<8x1xf32>
      %14 = vector.broadcast %13 : vector<8x1xf32> to vector<8x128xf32>
      %15 = arith.addf %12, %14 : vector<8x128xf32>
      %cst_14 = arith.constant 0.000000e+00 : f32
      %16 = vector.broadcast %cst_14 : f32 to vector<8x128xf32>
      %17 = arith.maximumf %15, %16 : vector<8x128xf32>
      %18 = arith.truncf %17 : vector<8x128xf32> to vector<8x128xbf16>
      %c0_15 = arith.constant 0 : index
      %c0_16 = arith.constant 0 : index
      %19 = vector.load %arg7[%c0_15, %c0_16] : memref<8x128xbf16, #tpu.memory_space<vmem>>, vector<8x128xbf16>
      tpu.vector_store %arg7[%c0_15, %c0_16], %18 {strides = array<i32>} : memref<8x128xbf16, #tpu.memory_space<vmem>>, vector<8x128xbf16>,
    } else {
    }
    return
  }
  func.func @transform_0(%arg0: i32, %arg1: i32) -> (i32, i32) {
    %c0_i32 = arith.constant 0 : i32
    return %arg1, %arg0 : i32, i32
  }
  func.func @transform_1(%arg0: i32, %arg1: i32) -> (i32, i32) {
    %c0_i32 = arith.constant 0 : i32
    %c0_i32_0 = arith.constant 0 : i32
    return %c0_i32, %arg1 : i32, i32
  }
  func.func @transform_2(%arg0: i32, %arg1: i32) -> (i32, i32) {
    %c0_i32 = arith.constant 0 : i32
    %c0_i32_0 = arith.constant 0 : i32
    %c0_i32_1 = arith.constant 0 : i32
    return %c0_i32, %c0_i32_0 : i32, i32
  }
  func.func @transform_3(%arg0: i32, %arg1: i32) -> (i32, i32) {
    %c0_i32 = arith.constant 0 : i32
    %c0_i32_0 = arith.constant 0 : i32
    return %c0_i32, %arg0 : i32, i32
  }
  func.func @transform_4(%arg0: i32, %arg1: i32) -> (i32, i32) {
    %c0_i32 = arith.constant 0 : i32
    %c0_i32_0 = arith.constant 0 : i32
    %c0_i32_1 = arith.constant 0 : i32
    return %c0_i32, %c0_i32_0 : i32, i32
  }
  func.func @transform_5(%arg0: i32, %arg1: i32) -> (i32, i32) {
    %c0_i32 = arith.constant 0 : i32
    %c0_i32_0 = arith.constant 0 : i32
    return %c0_i32, %arg0 : i32, i32
  }
  func.func @transform_6(%arg0: i32, %arg1: i32) -> (i32, i32) {
    %c0_i32 = arith.constant 0 : i32
    %c0_i32_0 = arith.constant 0 : i32
    return %c0_i32, %arg0 : i32, i32
  }
}

module attributes {stable_mosaic.version = 11 : i64} {
  func.func @_conv2_kernel(%arg0: i32, %arg1: i32, %arg2: memref<72x128xbf16, #tpu.memory_space<vmem>>, %arg3: memref<8x72xbf16, #tpu.memory_space<vmem>>, %arg4: memref<8x128xf32, #tpu.memory_space<vmem>>, %arg5: memref<8x128xf32, #tpu.memory_space<vmem>>, %arg6: memref<8x128xf32, #tpu.memory_space<vmem>>) attributes {dimension_semantics = [#tpu.dimension_semantics<parallel>, #tpu.dimension_semantics<arbitrary>], iteration_bounds = array<i64: 1, 1>, scalar_prefetch = 0 : i64, scratch_operands = 1 : i64, tpu.core_type = #tpu.core_type<tc>, window_params = [{transform_indices = @transform_0, window_bounds = array<i64: 72, 128>}, {transform_indices = @transform_1, window_bounds = array<i64: 8, 72>}, {transform_indices = @transform_2, window_bounds = array<i64: 8, 128>}, {transform_indices = @transform_3, window_bounds = array<i64: 8, 128>}]} {
    %c0_i32 = arith.constant 0 : i32
    %0 = arith.cmpi eq, %arg1, %c0_i32 : i32
    %1 = arith.extui %0 : i1 to i32
    %c0_i32_0 = arith.constant 0 : i32
    %2 = arith.cmpi ne, %1, %c0_i32_0 : i32
    scf.if %2 {
      %cst_10 = arith.constant 0.000000e+00 : f32
      %12 = vector.broadcast %cst_10 : f32 to vector<8x128xf32>
      %c0_11 = arith.constant 0 : index
      %c0_12 = arith.constant 0 : index
      %13 = vector.load %arg6[%c0_11, %c0_12] : memref<8x128xf32, #tpu.memory_space<vmem>>, vector<8x128xf32>
      tpu.vector_store %arg6[%c0_11, %c0_12], %12 {strides = array<i32>} : memref<8x128xf32, #tpu.memory_space<vmem>>, vector<8x128xf32>,
    } else {
    }
    %c0 = arith.constant 0 : index
    %c0_1 = arith.constant 0 : index
    %3 = vector.load %arg6[%c0, %c0_1] : memref<8x128xf32, #tpu.memory_space<vmem>>, vector<8x128xf32>
    %c0_2 = arith.constant 0 : index
    %c0_3 = arith.constant 0 : index
    %4 = vector.load %arg3[%c0_2, %c0_3] : memref<8x72xbf16, #tpu.memory_space<vmem>>, vector<8x72xbf16>
    %c0_4 = arith.constant 0 : index
    %c0_5 = arith.constant 0 : index
    %5 = vector.load %arg2[%c0_4, %c0_5] : memref<72x128xbf16, #tpu.memory_space<vmem>>, vector<72x128xbf16>
    %cst = arith.constant dense<0.000000e+00> : vector<8x128xf32>
    %6 = tpu.matmul %4, %5, %cst {dimension_numbers = #tpu.dot_dimension_numbers<[1], [0], [0], [1], [0, 0, 1, 1], [], []>} : vector<8x72xbf16>, vector<72x128xbf16>, vector<8x128xf32> -> vector<8x128xf32>
    %7 = arith.addf %3, %6 : vector<8x128xf32>
    %c0_6 = arith.constant 0 : index
    %c0_7 = arith.constant 0 : index
    %8 = vector.load %arg6[%c0_6, %c0_7] : memref<8x128xf32, #tpu.memory_space<vmem>>, vector<8x128xf32>
    tpu.vector_store %arg6[%c0_6, %c0_7], %7 {strides = array<i32>} : memref<8x128xf32, #tpu.memory_space<vmem>>, vector<8x128xf32>,
    %c0_i32_8 = arith.constant 0 : i32
    %9 = arith.cmpi eq, %arg1, %c0_i32_8 : i32
    %10 = arith.extui %9 : i1 to i32
    %c0_i32_9 = arith.constant 0 : i32
    %11 = arith.cmpi ne, %10, %c0_i32_9 : i32
    scf.if %11 {
      %c0_10 = arith.constant 0 : index
      %c0_11 = arith.constant 0 : index
      %12 = vector.load %arg6[%c0_10, %c0_11] : memref<8x128xf32, #tpu.memory_space<vmem>>, vector<8x128xf32>
      %c0_12 = arith.constant 0 : index
      %c0_13 = arith.constant 0 : index
      %13 = vector.load %arg4[%c0_12, %c0_13] : memref<8x128xf32, #tpu.memory_space<vmem>>, vector<8x128xf32>
      %14 = arith.addf %12, %13 : vector<8x128xf32>
      %c0_14 = arith.constant 0 : index
      %c0_15 = arith.constant 0 : index
      %15 = vector.load %arg5[%c0_14, %c0_15] : memref<8x128xf32, #tpu.memory_space<vmem>>, vector<8x128xf32>
      tpu.vector_store %arg5[%c0_14, %c0_15], %14 {strides = array<i32>} : memref<8x128xf32, #tpu.memory_space<vmem>>, vector<8x128xf32>,
    } else {
    }
    return
  }
  func.func @transform_0(%arg0: i32, %arg1: i32) -> (i32, i32) {
    %c0_i32 = arith.constant 0 : i32
    return %arg1, %arg0 : i32, i32
  }
  func.func @transform_1(%arg0: i32, %arg1: i32) -> (i32, i32) {
    %c0_i32 = arith.constant 0 : i32
    %c0_i32_0 = arith.constant 0 : i32
    return %c0_i32, %arg1 : i32, i32
  }
  func.func @transform_2(%arg0: i32, %arg1: i32) -> (i32, i32) {
    %c0_i32 = arith.constant 0 : i32
    %c0_i32_0 = arith.constant 0 : i32
    return %c0_i32, %arg0 : i32, i32
  }
  func.func @transform_3(%arg0: i32, %arg1: i32) -> (i32, i32) {
    %c0_i32 = arith.constant 0 : i32
    %c0_i32_0 = arith.constant 0 : i32
    return %c0_i32, %arg0 : i32, i32
  }
}

module attributes {stable_mosaic.version = 11 : i64} {
  func.func @_conv1_kernel(%arg0: i32, %arg1: i32, %arg2: memref<72x128xbf16, #tpu.memory_space<vmem>>, %arg3: memref<8x72xbf16, #tpu.memory_space<vmem>>, %arg4: memref<8x1xf32, #tpu.memory_space<vmem>>, %arg5: memref<8x128xbf16, #tpu.memory_space<vmem>>, %arg6: memref<8x128xf32, #tpu.memory_space<vmem>>) attributes {dimension_semantics = [#tpu.dimension_semantics<parallel>, #tpu.dimension_semantics<arbitrary>], iteration_bounds = array<i64: 1, 1>, scalar_prefetch = 0 : i64, scratch_operands = 1 : i64, tpu.core_type = #tpu.core_type<tc>, window_params = [{transform_indices = @transform_0, window_bounds = array<i64: 72, 128>}, {transform_indices = @transform_1, window_bounds = array<i64: 8, 72>}, {pipeline_mode = #tpu.pipeline_mode<synchronous>, transform_indices = @transform_2, window_bounds = array<i64: 8, 1>}, {transform_indices = @transform_3, window_bounds = array<i64: 8, 128>}]} {
    %c0_i32 = arith.constant 0 : i32
    %0 = arith.cmpi eq, %arg1, %c0_i32 : i32
    %1 = arith.extui %0 : i1 to i32
    %c0_i32_0 = arith.constant 0 : i32
    %2 = arith.cmpi ne, %1, %c0_i32_0 : i32
    scf.if %2 {
      %cst_10 = arith.constant 0.000000e+00 : f32
      %12 = vector.broadcast %cst_10 : f32 to vector<8x128xf32>
      %c0_11 = arith.constant 0 : index
      %c0_12 = arith.constant 0 : index
      %13 = vector.load %arg6[%c0_11, %c0_12] : memref<8x128xf32, #tpu.memory_space<vmem>>, vector<8x128xf32>
      tpu.vector_store %arg6[%c0_11, %c0_12], %12 {strides = array<i32>} : memref<8x128xf32, #tpu.memory_space<vmem>>, vector<8x128xf32>,
    } else {
    }
    %c0 = arith.constant 0 : index
    %c0_1 = arith.constant 0 : index
    %3 = vector.load %arg6[%c0, %c0_1] : memref<8x128xf32, #tpu.memory_space<vmem>>, vector<8x128xf32>
    %c0_2 = arith.constant 0 : index
    %c0_3 = arith.constant 0 : index
    %4 = vector.load %arg3[%c0_2, %c0_3] : memref<8x72xbf16, #tpu.memory_space<vmem>>, vector<8x72xbf16>
    %c0_4 = arith.constant 0 : index
    %c0_5 = arith.constant 0 : index
    %5 = vector.load %arg2[%c0_4, %c0_5] : memref<72x128xbf16, #tpu.memory_space<vmem>>, vector<72x128xbf16>
    %cst = arith.constant dense<0.000000e+00> : vector<8x128xf32>
    %6 = tpu.matmul %4, %5, %cst {dimension_numbers = #tpu.dot_dimension_numbers<[1], [0], [0], [1], [0, 0, 1, 1], [], []>} : vector<8x72xbf16>, vector<72x128xbf16>, vector<8x128xf32> -> vector<8x128xf32>
    %7 = arith.addf %3, %6 : vector<8x128xf32>
    %c0_6 = arith.constant 0 : index
    %c0_7 = arith.constant 0 : index
    %8 = vector.load %arg6[%c0_6, %c0_7] : memref<8x128xf32, #tpu.memory_space<vmem>>, vector<8x128xf32>
    tpu.vector_store %arg6[%c0_6, %c0_7], %7 {strides = array<i32>} : memref<8x128xf32, #tpu.memory_space<vmem>>, vector<8x128xf32>,
    %c0_i32_8 = arith.constant 0 : i32
    %9 = arith.cmpi eq, %arg1, %c0_i32_8 : i32
    %10 = arith.extui %9 : i1 to i32
    %c0_i32_9 = arith.constant 0 : i32
    %11 = arith.cmpi ne, %10, %c0_i32_9 : i32
    scf.if %11 {
      %c0_10 = arith.constant 0 : index
      %c0_11 = arith.constant 0 : index
      %12 = vector.load %arg6[%c0_10, %c0_11] : memref<8x128xf32, #tpu.memory_space<vmem>>, vector<8x128xf32>
      %c0_12 = arith.constant 0 : index
      %c0_13 = arith.constant 0 : index
      %13 = vector.load %arg4[%c0_12, %c0_13] : memref<8x1xf32, #tpu.memory_space<vmem>>, vector<8x1xf32>
      %14 = vector.broadcast %13 : vector<8x1xf32> to vector<8x128xf32>
      %15 = arith.addf %12, %14 : vector<8x128xf32>
      %cst_14 = arith.constant 0.000000e+00 : f32
      %16 = vector.broadcast %cst_14 : f32 to vector<8x128xf32>
      %17 = arith.maximumf %15, %16 : vector<8x128xf32>
      %18 = arith.truncf %17 : vector<8x128xf32> to vector<8x128xbf16>
      %c0_15 = arith.constant 0 : index
      %c0_16 = arith.constant 0 : index
      %19 = vector.load %arg5[%c0_15, %c0_16] : memref<8x128xbf16, #tpu.memory_space<vmem>>, vector<8x128xbf16>
      tpu.vector_store %arg5[%c0_15, %c0_16], %18 {strides = array<i32>} : memref<8x128xbf16, #tpu.memory_space<vmem>>, vector<8x128xbf16>,
    } else {
    }
    return
  }
  func.func @transform_0(%arg0: i32, %arg1: i32) -> (i32, i32) {
    %c0_i32 = arith.constant 0 : i32
    return %arg1, %arg0 : i32, i32
  }
  func.func @transform_1(%arg0: i32, %arg1: i32) -> (i32, i32) {
    %c0_i32 = arith.constant 0 : i32
    %c0_i32_0 = arith.constant 0 : i32
    return %c0_i32, %arg1 : i32, i32
  }
  func.func @transform_2(%arg0: i32, %arg1: i32) -> (i32, i32) {
    %c0_i32 = arith.constant 0 : i32
    %c0_i32_0 = arith.constant 0 : i32
    %c0_i32_1 = arith.constant 0 : i32
    return %c0_i32, %c0_i32_0 : i32, i32
  }
  func.func @transform_3(%arg0: i32, %arg1: i32) -> (i32, i32) {
    %c0_i32 = arith.constant 0 : i32
    %c0_i32_0 = arith.constant 0 : i32
    return %c0_i32, %arg0 : i32, i32
  }
}

</mosaic_0001>

<bundles_post_ra>
// kernel: network_block_forward.4
= control target key start
LH: loop header
LB: loop body
LE: loop exit
PB: predicated region body
PF: predicated region fallthrough
CT: control target
= control target key end

     0   :  { %vm34_vm0 = vcmask 1043456   ;;  %v207_v0 = vmov 0.0   ;;  %vm208_vm1 = vmmov 0   ;;  %vm30_vm2 = vcmask 64512   ;;  %s272_s0 = inlined_call_operand.vmem [shape: bf16[40,128], index: 0, kind: input, shape index: {}]   ;;  %s273_s3 = inlined_call_operand.vmem [shape: bf16[8,128], index: 3, kind: input, shape index: {}]   ;;  %s274_s4 = inlined_call_operand.vmem [shape: bf16[8,8], index: 4, kind: input, shape index: {}]   ;;  %s275_s2 = inlined_call_operand.vmem [shape: f32[8,1], index: 2, kind: input, shape index: {}]   ;;  %s276_s1 = inlined_call_operand.vmem [shape: bf16[8,40], index: 1, kind: input, shape index: {}]   ;;  %s277_s6 = inlined_call_operand.vmem [shape: f32[8,128], index: 6, kind: output, shape index: {1}]   ;;  %s278_s5 = inlined_call_operand.vmem [shape: bf16[8,128], index: 5, kind: output, shape index: {0}]  }
   0x1   :  { %190 = vmatprep.subr.bf16.mxu1 %v207_v0  ;;  %v204_v1 = vld [vmem:[%s272_s0 + $0x10] ss:$0 sps:$4 sm:$0xff]   ;;  %184 = vmatprep.subr.bf16.mxu0 %v207_v0  ;;  %v29_v2 = vld [vmem:[%s273_s3] sm:$0xf]  ;;  %v205_v6 = vld [vmem:[%s272_s0 + $0x8] sm:$0xff]   ;;  %v209_v7 = vmov 0  }
   0x2   :  { %v36_v3 = vsel %vm34_vm0, %v29_v2, 0  ;;  %186 = vmatprep.mubr.msk.bf16.mxu0 %vm208_vm1, %v207_v0  ;;  %196 = vmatprep.mubr.msk.bf16.mxu1 %vm208_vm1, %v207_v0  ;;  %v107_v4 = vsel %vm34_vm0, %v204_v1, 0  ;;  %v28_v5 = vld [vmem:[%s274_s4] sm:$0xf]  ;;  %vm101_vm3 = vcmask 326656  }
   0x3   :  { %185 = vmatpush3.bf16.msra.mxu0 %v36_v3  ;;  %191 = vmatpush3.bf16.msra.mxu1 %v107_v4  ;;  %v155_v8 = vld [vmem:[%s275_s2] sm:$0xff] }
   0x4   :  { %192 = vmatprep.subr.bf16.mxu1 %v207_v0  ;;  %203 = vset.pattern.permute.xlu0 %v209_v7  ;;  %v206_v9 = vld [vmem:[%s272_s0] sm:$0xff]  }
   0x5   :  { %158 = vperm.xlu0 %203, %v155_v8   ;;  %v80_v10 = vld [vmem:[%s276_s1] sm:$0xf] }
   0x6   :  { %187 = vmatmul.mubr.msk.bf16.vlgmr.msra.gmra.mxu0 %vm30_vm2, %v28_v5 }
   0x7   :  { %193 = vmatpush3.bf16.msra.mxu1 %v205_v6 }
   0x8   :  { %194 = vmatprep.subr.bf16.mxu1 %v207_v0 }
   0xb   :  { %195 = vmatpush3.bf16.msra.mxu1 %v206_v9 }
   0xe   :  { %197 = vmatmul.mubr.msk.bf16.vlgmr.msra.gmra.mxu1 %vm101_vm3, %v80_v10 }
  0x80   :  { %v159_v15 = vpop.permute.xlu0 %158 }
  0xc6   :  { %v72_v11 = vpop.f32.mrf.mxu0 }
  0xc7   :  { %78 = vst [vmem:[%s277_s6] sm:$0xff] %v72_v11 }
  0xc8   :  { %v188_v12 = vpop.f32.mrf.mxu0 }
  0xca   :  { %v75_v13 = vpop.f32.mrf.mxu0 }
  0xcc   :  { %v189_v14 = vpop.f32.mrf.mxu0 }
  0xce   :  { %v143_v16 = vpop.f32.mrf.mxu1 }
  0xcf   :  { %v161_v17 = vadd.f32 %v159_v15, %v143_v16 }
  0xd0   :  { %v198_v18 = vpop.f32.mrf.mxu1 }
  0xd1   :  { %v162_v19 = vmax.f32 %v161_v17, 0.0 }
  0xd2   :  { %v146_v20 = vpop.f32.mrf.mxu1 }
  0xd3   :  { %v163_v21 = vpack.c.bf16 %v162_v19, %v162_v19 }
  0xd4   :  { %v199_v22 = vpop.f32.mrf.mxu1 }
  0xd5   :  { %164 = vst [vmem:[%s278_s5] sm:$0xf] %v163_v21 }

// kernel: network_block_forward.5
= control target key start
LH: loop header
LB: loop body
LE: loop exit
PB: predicated region body
PF: predicated region fallthrough
CT: control target
= control target key end

     0   :  { %vm62_vm0 = vcmask 1043456   ;;  %v152_v0 = vmov 0.0   ;;  %vm153_vm1 = vmmov 0   ;;  %vm58_vm2 = vcmask 588800   ;;  %s198_s0 = inlined_call_operand.vmem [shape: bf16[72,128], index: 0, kind: input, shape index: {}]   ;;  %s199_s1 = inlined_call_operand.vmem [shape: bf16[8,72], index: 1, kind: input, shape index: {}]   ;;  %s200_s2 = inlined_call_operand.vmem [shape: f32[8,128], index: 2, kind: input, shape index: {}]   ;;  %s201_s3 = inlined_call_operand.vmem [shape: f32[8,128], index: 3, kind: output, shape index: {}]  }
   0x1   :  { %131 = vmatprep.subr.bf16.mxu0 %v152_v0  ;;  %v147_v1 = vld [vmem:[%s198_s0 + $0x20] ss:$0 sps:$4 sm:$0xff]   ;;  %141 = vmatprep.mubr.msk.bf16.mxu0 %vm153_vm1, %v152_v0  ;;  %v148_v3 = vld [vmem:[%s198_s0 + $0x18] sm:$0xff]   ;;  %v149_v4 = vld [vmem:[%s198_s0 + $0x10] sm:$0xff]  }
   0x2   :  { %v64_v2 = vsel %vm62_vm0, %v147_v1, 0  ;;  %v150_v5 = vld [vmem:[%s198_s0 + $0x8] sm:$0xff]   ;;  %v151_v6 = vld [vmem:[%s198_s0] sm:$0xff]  }
   0x3   :  { %132 = vmatpush3.bf16.msra.mxu0 %v64_v2  ;;  %v21_v7 = vld [vmem:[%s199_s1] sm:$0xf] }
   0x4   :  { %133 = vmatprep.subr.bf16.mxu0 %v152_v0  ;;  %v112_v8 = vld [vmem:[%s200_s2] sm:$0xff] }
   0x7   :  { %134 = vmatpush3.bf16.msra.mxu0 %v148_v3 }
   0x8   :  { %135 = vmatprep.subr.bf16.mxu0 %v152_v0 }
   0xb   :  { %136 = vmatpush3.bf16.msra.mxu0 %v149_v4 }
   0xc   :  { %137 = vmatprep.subr.bf16.mxu0 %v152_v0 }
   0xf   :  { %138 = vmatpush3.bf16.msra.mxu0 %v150_v5 }
  0x10   :  { %139 = vmatprep.subr.bf16.mxu0 %v152_v0 }
  0x13   :  { %140 = vmatpush3.bf16.msra.mxu0 %v151_v6 }
  0x16   :  { %142 = vmatmul.mubr.msk.bf16.vlgmr.msra.gmra.mxu0 %vm58_vm2, %v21_v7 }
  0xd6   :  { %v100_v9 = vpop.f32.mrf.mxu0 }
  0xd7   :  { %v113_v10 = vadd.f32 %v112_v8, %v100_v9 }
  0xd8   :  { %v143_v11 = vpop.f32.mrf.mxu0 }
  0xd9   :  { %114 = vst [vmem:[%s201_s3] sm:$0xff] %v113_v10 }
  0xda   :  { %v103_v12 = vpop.f32.mrf.mxu0 }
  0xdc   :  { %v144_v13 = vpop.f32.mrf.mxu0 }

// kernel: network_block_forward.6
= control target key start
LH: loop header
LB: loop body
LE: loop exit
PB: predicated region body
PF: predicated region fallthrough
CT: control target
= control target key end

     0   :  { %vm62_vm0 = vcmask 1043456   ;;  %v161_v0 = vmov 0.0   ;;  %vm162_vm1 = vmmov 0   ;;  %v163_v3 = vmov 0   ;;  %s208_s0 = inlined_call_operand.vmem [shape: bf16[72,128], index: 0, kind: input, shape index: {}]   ;;  %s209_s2 = inlined_call_operand.vmem [shape: f32[8,1], index: 2, kind: input, shape index: {}]   ;;  %s210_s1 = inlined_call_operand.vmem [shape: bf16[8,72], index: 1, kind: input, shape index: {}]   ;;  %s211_s3 = inlined_call_operand.vmem [shape: bf16[8,128], index: 3, kind: output, shape index: {}]  }
   0x1   :  { %138 = vmatprep.subr.bf16.mxu0 %v161_v0  ;;  %v156_v1 = vld [vmem:[%s208_s0 + $0x20] ss:$0 sps:$4 sm:$0xff]   ;;  %148 = vmatprep.mubr.msk.bf16.mxu0 %vm162_vm1, %v161_v0  ;;  %v157_v4 = vld [vmem:[%s208_s0 + $0x18] sm:$0xff]   ;;  %v158_v6 = vld [vmem:[%s208_s0 + $0x10] sm:$0xff]   ;;  %vm58_vm2 = vcmask 588800  }
   0x2   :  { %v64_v2 = vsel %vm62_vm0, %v156_v1, 0  ;;  %155 = vset.pattern.permute.xlu0 %v163_v3  ;;  %v112_v5 = vld [vmem:[%s209_s2] sm:$0xff]  ;;  %v159_v7 = vld [vmem:[%s208_s0 + $0x8] sm:$0xff]  }
   0x3   :  { %139 = vmatpush3.bf16.msra.mxu0 %v64_v2  ;;  %115 = vperm.xlu0 %155, %v112_v5   ;;  %v160_v8 = vld [vmem:[%s208_s0] sm:$0xff]  }
   0x4   :  { %140 = vmatprep.subr.bf16.mxu0 %v161_v0  ;;  %v21_v9 = vld [vmem:[%s210_s1] sm:$0xf] }
   0x7   :  { %141 = vmatpush3.bf16.msra.mxu0 %v157_v4 }
   0x8   :  { %142 = vmatprep.subr.bf16.mxu0 %v161_v0 }
   0xb   :  { %143 = vmatpush3.bf16.msra.mxu0 %v158_v6 }
   0xc   :  { %144 = vmatprep.subr.bf16.mxu0 %v161_v0 }
   0xf   :  { %145 = vmatpush3.bf16.msra.mxu0 %v159_v7 }
  0x10   :  { %146 = vmatprep.subr.bf16.mxu0 %v161_v0 }
  0x13   :  { %147 = vmatpush3.bf16.msra.mxu0 %v160_v8 }
  0x16   :  { %149 = vmatmul.mubr.msk.bf16.vlgmr.msra.gmra.mxu0 %vm58_vm2, %v21_v9 }
  0x7e   :  { %v116_v10 = vpop.permute.xlu0 %115 }
  0xd6   :  { %v100_v11 = vpop.f32.mrf.mxu0 }
  0xd7   :  { %v118_v12 = vadd.f32 %v116_v10, %v100_v11 }
  0xd8   :  { %v150_v13 = vpop.f32.mrf.mxu0 }
  0xd9   :  { %v119_v14 = vmax.f32 %v118_v12, 0.0 }
  0xda   :  { %v103_v15 = vpop.f32.mrf.mxu0 }
  0xdb   :  { %v120_v16 = vpack.c.bf16 %v119_v14, %v119_v14 }
  0xdc   :  { %v151_v17 = vpop.f32.mrf.mxu0 }
  0xdd   :  { %121 = vst [vmem:[%s211_s3] sm:$0xf] %v120_v16 }

</bundles_post_ra>
